<compile_context>
chip_gen: v7x
topology: tpu7x:2x2x1
jax: 0.10.0
libtpu: 0.0.40
codegen_flags: <defaults>
</compile_context>

<pallas_src>
import jax
import jax.numpy as jnp
from jax.experimental import pallas as pl
from jax.experimental.pallas import tpu as pltpu

LANE = 128
_TARGET_BLOCK_ROWS = 4096          # per-input tile: 2 MiB (f32) / 1 MiB (bf16)
_VMEM_LIMIT_BYTES = 40 * 1024 * 1024


def _num_tensorcores():
    """Best-effort TensorCores-per-chip (2 on v7x megacore, else 1)."""
    # TODO(synk): confirm the TpuInfo field name for TensorCores/chip on v7x.
    try:
        info = pltpu.get_tpu_info()
    except Exception:
        return 1
    for attr in ("num_tensorcores", "tensorcore_count", "num_cores"):
        v = getattr(info, attr, None)
        if isinstance(v, int) and 1 <= v <= 8:
            return v
    return 1


def _base_loss(xp, x, mode, pos_weight, beta=2.0):
    """Elementwise loss in f32 (shared by kernel, tail path and reference-free)."""
    if mode == "MSE":
        return (xp - x) * (xp - x)
    if mode == "smooth_l1":
        d = jnp.abs(xp - x)
        return jnp.where(d < beta, 0.5 * d * d / beta, d - 0.5 * beta)
    if mode == "L1":
        return jnp.abs(xp - x)
    if mode == "BCE":
        # BCEWithLogitsLoss(pos_weight): one softplus chain via
        # softplus(xp) = softplus(-xp) + xp  (halves EUP traffic).
        sp = jax.nn.softplus(-xp)
        return sp * (pos_weight * x + (1.0 - x)) + (1.0 - x) * xp
    raise ValueError(f"Invalid mode: {mode}")


def _make_kernel(mode, weighted, need_den, pos_weight, rows_main, block_rows,
                 n_cores, steps, total_blocks, acc_rows, eps=1e-6, beta=2.0):
    has_ragged = (rows_main % block_rows) != 0
    has_dup = (n_cores * steps) > total_blocks
    last_block = total_blocks - 1

    def fold(v):
        # Fold (block_rows, 128) into the (acc_rows, 128) accumulator shape
        # with pure vreg adds (no cross-lane movement).
        if acc_rows == block_rows:
            return v
        return v.reshape(block_rows // acc_rows, acc_rows, LANE).sum(axis=0)

    def kernel(xp_ref, x_ref, *rest):
        if need_den:
            loss_ref, wsum_ref, acc_loss, acc_den = rest
        else:
            loss_ref, acc_loss = rest
            wsum_ref = acc_den = None

        c = pl.program_id(0)
        i = pl.program_id(1)

        @pl.when(i == 0)
        def _init():
            acc_loss[...] = jnp.zeros_like(acc_loss)
            if need_den:
                acc_den[...] = jnp.zeros_like(acc_den)

        xp = xp_ref[...].astype(jnp.float32)
        x = x_ref[...].astype(jnp.float32)

        base = _base_loss(xp, x, mode, pos_weight, beta)
        if weighted:
            # Exact reciprocal: weight can be ~1e6 near |x|=0, approx is lossy.
            w = 1.0 / jnp.tanh(jnp.abs(x) + eps)
            val = base * w
            den = w
        else:
            val = base
            den = None

        def accumulate(v, d):
            acc_loss[...] += fold(v)
            if need_den:
                acc_den[...] += fold(d)

        if not (has_ragged or has_dup):
            # Fast path: every block is fully valid -> no mask, no predicates.
            accumulate(val, den)
        else:
            b = c * steps + i                       # unclamped block index
            row_start = b * block_rows
            not_dup = (b <= last_block) if has_dup else True
            full = (row_start + block_rows <= rows_main) if has_ragged else True

            if has_dup and has_ragged:
                fast_pred = jnp.logical_and(not_dup, full)
            elif has_dup:
                fast_pred = not_dup
            else:
                fast_pred = full

            @pl.when(fast_pred)
            def _fast():
                accumulate(val, den)

            if has_ragged:
                if has_dup:
                    mask_pred = jnp.logical_and(not_dup, jnp.logical_not(full))
                else:
                    mask_pred = jnp.logical_not(full)

                @pl.when(mask_pred)
                def _masked():
                    rows_left = rows_main - row_start
                    row_iota = jax.lax.broadcasted_iota(
                        jnp.int32, (block_rows, LANE), 0)
                    valid = row_iota < rows_left
                    # where AFTER the math: garbage (NaN/Inf) in the padded
                    # region is selected away, never accumulated.
                    mval = jnp.where(valid, val, 0.0)
                    mden = jnp.where(valid, den, 0.0) if need_den else None
                    accumulate(mval, mden)
            # Duplicate blocks (b > last_block) accumulate nothing.

        @pl.when(i == steps - 1)
        def _finalize():
            loss_ref[0, 0] = jnp.sum(acc_loss[...])
            if need_den:
                wsum_ref[0, 0] = jnp.sum(acc_den[...])

    return kernel


def _run_main_kernel(xp2d, x2d, mode, weighted, need_den, pos_weight):
    """Streams the lane-aligned (rows_main, 128) slab and returns partial sums."""
    rows_main = xp2d.shape[0]
    itemsize = jnp.dtype(xp2d.dtype).itemsize

    if rows_main <= 8:
        block_rows = rows_main                 # full-extent block (allowed)
    else:
        block_rows = min(rows_main, _TARGET_BLOCK_ROWS)
        block_rows -= block_rows % 8           # multiple of 8, >= 8

    acc_rows = 8 if (block_rows % 8 == 0 and block_rows >= 8) else block_rows
    total_blocks = -(-rows_main // block_rows)
    n_cores = max(1, min(_num_tensorcores(), total_blocks))
    steps = -(-total_blocks // n_cores)
    has_dup = n_cores * steps > total_blocks
    last_block = total_blocks - 1

    if has_dup:
        def in_map(c, i):
            # Clamp so the DMA window stays in-bounds; the kernel skips
            # accumulation for these duplicated blocks.
            return (jnp.minimum(c * steps + i, last_block), 0)
    else:
        def in_map(c, i):
            return (c * steps + i, 0)

    tile_spec = pl.BlockSpec((block_rows, LANE), in_map)
    out_spec = pl.BlockSpec((1, 1), lambda c, i: (c, 0),
                            memory_space=pltpu.MemorySpace.SMEM)

    kernel = _make_kernel(mode, weighted, need_den, pos_weight, rows_main,
                          block_rows, n_cores, steps, total_blocks, acc_rows)

    out_shapes = [jax.ShapeDtypeStruct((n_cores, 1), jnp.float32)]
    out_specs = [out_spec]
    scratch = [pltpu.VMEM((acc_rows, LANE), jnp.float32)]
    if need_den:
        out_shapes.append(jax.ShapeDtypeStruct((n_cores, 1), jnp.float32))
        out_specs.append(out_spec)
        scratch.append(pltpu.VMEM((acc_rows, LANE), jnp.float32))

    n_main = rows_main * LANE
    transc = (2 * n_main) if (weighted or mode == "BCE") else 0
    cost = pl.CostEstimate(flops=10 * n_main, transcendentals=transc,
                           bytes_accessed=2 * n_main * itemsize)

    outs = pl.pallas_call(
        kernel,
        out_shape=tuple(out_shapes),
        grid_spec=pltpu.PrefetchScalarGridSpec(
            num_scalar_prefetch=0,
            grid=(n_cores, steps),
            in_specs=[tile_spec, tile_spec],
            out_specs=tuple(out_specs),
            scratch_shapes=scratch,
        ),
        compiler_params=pltpu.CompilerParams(
            dimension_semantics=("parallel", "arbitrary"),
            vmem_limit_bytes=_VMEM_LIMIT_BYTES),
        cost_estimate=cost,
    )(xp2d, x2d)

    loss_sum = jnp.sum(outs[0])
    den_sum = jnp.sum(outs[1]) if need_den else None
    return loss_sum, den_sum


def get_recon_loss(x_pred, x, mode="MSE", reduction="sum", weight=(45.0,)):
    """JAX/Pallas equivalent of get_recon_loss(mode, reduction, weight)(x_pred, x)."""
    assert x_pred.shape == x.shape
    assert isinstance(mode, str)
    if mode not in ("MSE", "smooth_l1", "L1", "BCE"):
        raise ValueError(f"Invalid mode: {mode}")
    if reduction not in ("sum", "mean"):
        raise ValueError(f"Invalid reduction: {reduction}")

    # Mirrors the module's (precedence-sensitive) weighting condition:
    #   (weight is not None and mode == 'MSE') or mode == 'smooth_l1' or mode == 'L1'
    weighted = (weight is not None and mode == "MSE") or mode in ("smooth_l1", "L1")
    # TODO(synk): PyTorch BCE pos_weight may be per-class; scalar weight[0] assumed.
    pos_weight = float(weight[0]) if weight is not None else 1.0
    need_den = weighted and reduction == "mean"

    n = int(x.size)
    xp_f = jnp.ravel(x_pred)
    x_f = jnp.ravel(x)

    rows_main = n // LANE
    n_main = rows_main * LANE
    tail = n - n_main

    loss_sum = jnp.float32(0.0)
    den_sum = jnp.float32(0.0)

    if rows_main > 0:
        # Free reshape when n is lane-aligned (no pad, no copy). Otherwise the
        # kernel streams only the aligned prefix; the <128-element tail is
        # handled below in plain JAX.
        xp_main = xp_f if tail == 0 else xp_f[:n_main]
        x_main = x_f if tail == 0 else x_f[:n_main]
        k_loss, k_den = _run_main_kernel(xp_main.reshape(rows_main, LANE),
                                         x_main.reshape(rows_main, LANE),
                                         mode, weighted, need_den, pos_weight)
        loss_sum = loss_sum + k_loss
        if need_den:
            den_sum = den_sum + k_den

    if tail:
        xt_p = xp_f[n_main:].astype(jnp.float32)
        xt = x_f[n_main:].astype(jnp.float32)
        base_t = _base_loss(xt_p, xt, mode, pos_weight)
        if weighted:
            w_t = 1.0 / jnp.tanh(jnp.abs(xt) + 1e-6)
            loss_sum = loss_sum + jnp.sum(base_t * w_t)
            if need_den:
                den_sum = den_sum + jnp.sum(w_t)
        else:
            loss_sum = loss_sum + jnp.sum(base_t)

    if reduction == "sum":
        return loss_sum
    # reduction == 'mean'
    if weighted:
        return loss_sum / den_sum
    return loss_sum / jnp.float32(n)   # unweighted mean: denominator is static n


def _reference(x_pred, x, mode="MSE", reduction="sum", weight=(45.0,)):
    """Pure-JAX reference mirroring the PyTorch forward exactly."""
    xp = x_pred.astype(jnp.float32)
    xx = x.astype(jnp.float32)
    if mode == "MSE":
        loss = (xp - xx) ** 2
    elif mode == "smooth_l1":
        beta = 2.0
        d = jnp.abs(xp - xx)
        loss = jnp.where(d < beta, 0.5 * d * d / beta, d - 0.5 * beta)
    elif mode == "L1":
        loss = jnp.abs(xp - xx)
    elif mode == "BCE":
        pw = float(weight[0]) if weight is not None else 1.0
        loss = pw * xx * jax.nn.softplus(-xp) + (1.0 - xx) * jax.nn.softplus(xp)
    else:
        raise ValueError(mode)

    if (weight is not None and mode == "MSE") or mode in ("smooth_l1", "L1"):
        w = 1.0 / jnp.tanh(jnp.abs(xx) + 1e-6)
        wl = loss * w
        return wl.sum() if reduction == "sum" else wl.sum() / w.sum()
    return loss.sum() if reduction == "sum" else loss.mean()


def _check(out, ref, tag):
    out = jax.block_until_ready(out)
    assert jnp.allclose(out, ref, rtol=2e-3, atol=1e-3), (tag, out, ref)


if __name__ == "__main__":
    key = jax.random.PRNGKey(0)
    k1, k2, k3, k4, k5, k6, k7 = jax.random.split(key, 7)

    # Default module config: mode='MSE', reduction='sum', weight=[45.0],
    # on NCHW conv-style activations: batch=2, channels=4, spatial=16x16.
    x_pred = jax.random.normal(k1, (2, 4, 16, 16), dtype=jnp.float32)
    x = jax.random.normal(k2, (2, 4, 16, 16), dtype=jnp.float32)

    out = get_recon_loss(x_pred, x, mode="MSE", reduction="sum", weight=(45.0,))
    _check(out, _reference(x_pred, x, "MSE", "sum", (45.0,)), "MSE/sum")

    out = get_recon_loss(x_pred, x, mode="MSE", reduction="mean", weight=(45.0,))
    _check(out, _reference(x_pred, x, "MSE", "mean", (45.0,)), "MSE/mean")

    # Ragged-rows case (rows not a multiple of block_rows) + weighted smooth_l1.
    xp_r = jax.random.normal(k3, (2, 4, 16, 20), dtype=jnp.float32)
    x_r = jax.random.normal(k4, (2, 4, 16, 20), dtype=jnp.float32)
    out = get_recon_loss(xp_r, x_r, mode="smooth_l1", reduction="sum", weight=(45.0,))
    _check(out, _reference(xp_r, x_r, "smooth_l1", "sum", (45.0,)), "smooth_l1/sum")

    # Non-lane-aligned size (tail handled in the wrapper, no pad/copy of inputs).
    xp_t = jax.random.normal(k5, (2, 3, 7, 5), dtype=jnp.float32)
    x_t = jax.random.normal(k6, (2, 3, 7, 5), dtype=jnp.float32)
    out = get_recon_loss(xp_t, x_t, mode="L1", reduction="sum", weight=(45.0,))
    _check(out, _reference(xp_t, x_t, "L1", "sum", (45.0,)), "L1/sum tail")

    # BCE (unweighted loss path, pos_weight from weight[0]).
    x_bce = jax.random.uniform(k7, (2, 4, 16, 16), dtype=jnp.float32)
    out = get_recon_loss(x_pred, x_bce, mode="BCE", reduction="mean", weight=(45.0,))
    _check(out, _reference(x_pred, x_bce, "BCE", "mean", (45.0,)), "BCE/mean")

    print("KERNEL_OK")
</pallas_src>

<mosaic_0001>
module attributes {stable_mosaic.version = 11 : i64} {
  func.func @kernel(%arg0: i32, %arg1: i32, %arg2: memref<16x128xf32, #tpu.memory_space<vmem>>, %arg3: memref<16x128xf32, #tpu.memory_space<vmem>>, %arg4: memref<1x1xf32, #tpu.memory_space<smem>>, %arg5: memref<8x128xf32, #tpu.memory_space<vmem>>) attributes {dimension_semantics = [#tpu.dimension_semantics<parallel>, #tpu.dimension_semantics<arbitrary>], iteration_bounds = array<i64: 1, 1>, scalar_prefetch = 0 : i64, scratch_operands = 1 : i64, tpu.core_type = #tpu.core_type<tc>, window_params = [{transform_indices = @transform_0, window_bounds = array<i64: 16, 128>}, {transform_indices = @transform_1, window_bounds = array<i64: 16, 128>}, {transform_indices = @transform_2, window_bounds = array<i64: 1, 1>}]} {
    %c0_i32 = arith.constant 0 : i32
    %0 = arith.cmpi eq, %arg1, %c0_i32 : i32
    %1 = arith.extui %0 : i1 to i32
    %c0_i32_0 = arith.constant 0 : i32
    %2 = arith.cmpi ne, %1, %c0_i32_0 : i32
    scf.if %2 {
      %cst_12 = arith.constant 0.000000e+00 : f32
      %23 = vector.broadcast %cst_12 : f32 to vector<8x128xf32>
      %c0_13 = arith.constant 0 : index
      %c0_14 = arith.constant 0 : index
      %24 = vector.load %arg5[%c0_13, %c0_14] : memref<8x128xf32, #tpu.memory_space<vmem>>, vector<8x128xf32>
      tpu.vector_store %arg5[%c0_13, %c0_14], %23 {strides = array<i32>} : memref<8x128xf32, #tpu.memory_space<vmem>>, vector<8x128xf32>,
    } else {
    }
    %c0 = arith.constant 0 : index
    %c0_1 = arith.constant 0 : index
    %3 = vector.load %arg2[%c0, %c0_1] : memref<16x128xf32, #tpu.memory_space<vmem>>, vector<16x128xf32>
    %c0_2 = arith.constant 0 : index
    %c0_3 = arith.constant 0 : index
    %4 = vector.load %arg3[%c0_2, %c0_3] : memref<16x128xf32, #tpu.memory_space<vmem>>, vector<16x128xf32>
    %5 = arith.subf %3, %4 : vector<16x128xf32>
    %6 = arith.subf %3, %4 : vector<16x128xf32>
    %7 = arith.mulf %5, %6 : vector<16x128xf32>
    %8 = math.absf %4 : vector<16x128xf32>
    %cst = arith.constant 9.99999997E-7 : f32
    %9 = vector.broadcast %cst : f32 to vector<16x128xf32>
    %10 = arith.addf %8, %9 : vector<16x128xf32>
    %11 = math.tanh %10 : vector<16x128xf32>
    %cst_4 = arith.constant 1.000000e+00 : f32
    %12 = vector.broadcast %cst_4 : f32 to vector<16x128xf32>
    %13 = arith.divf %12, %11 : vector<16x128xf32>
    %14 = arith.mulf %7, %13 : vector<16x128xf32>
    %c0_5 = arith.constant 0 : index
    %c0_6 = arith.constant 0 : index
    %15 = vector.load %arg5[%c0_5, %c0_6] : memref<8x128xf32, #tpu.memory_space<vmem>>, vector<8x128xf32>
    %16 = vector.shape_cast %14 : vector<16x128xf32> to vector<2x8x128xf32>
    %cst_7 = arith.constant dense<0.000000e+00> : vector<8x128xf32>
    %17 = vector.multi_reduction <add>, %16, %cst_7 [0] : vector<2x8x128xf32> to vector<8x128xf32>
    %18 = arith.addf %15, %17 : vector<8x128xf32>
    %c0_8 = arith.constant 0 : index
    %c0_9 = arith.constant 0 : index
    %19 = vector.load %arg5[%c0_8, %c0_9] : memref<8x128xf32, #tpu.memory_space<vmem>>, vector<8x128xf32>
    tpu.vector_store %arg5[%c0_8, %c0_9], %18 {strides = array<i32>} : memref<8x128xf32, #tpu.memory_space<vmem>>, vector<8x128xf32>,
    %c0_i32_10 = arith.constant 0 : i32
    %20 = arith.cmpi eq, %arg1, %c0_i32_10 : i32
    %21 = arith.extui %20 : i1 to i32
    %c0_i32_11 = arith.constant 0 : i32
    %22 = arith.cmpi ne, %21, %c0_i32_11 : i32
    scf.if %22 {
      %c0_12 = arith.constant 0 : index
      %c0_13 = arith.constant 0 : index
      %23 = vector.load %arg5[%c0_12, %c0_13] : memref<8x128xf32, #tpu.memory_space<vmem>>, vector<8x128xf32>
      %24 = vector.shape_cast %23 : vector<8x128xf32> to vector<1x8x128xf32>
      %cst_14 = arith.constant dense<0.000000e+00> : vector<1xf32>
      %25 = vector.multi_reduction <add>, %24, %cst_14 [1, 2] : vector<1x8x128xf32> to vector<1xf32>
      %26 = vector.shape_cast %25 : vector<1xf32> to vector<1x1x1xf32>
      %27 = vector.extract %26[0, 0, 0] : f32 from vector<1x1x1xf32>
      %c0_15 = arith.constant 0 : index
      %c0_16 = arith.constant 0 : index
      %28 = memref.load %arg4[%c0_15, %c0_16] : memref<1x1xf32, #tpu.memory_space<smem>>
      memref.store %27, %arg4[%c0_15, %c0_16] : memref<1x1xf32, #tpu.memory_space<smem>>
    } else {
    }
    return
  }
  func.func @transform_0(%arg0: i32, %arg1: i32) -> (i32, i32) {
    %c1_i32 = arith.constant 1 : i32
    %0 = arith.muli %arg0, %c1_i32 : i32
    %1 = arith.addi %0, %arg1 : i32
    %c0_i32 = arith.constant 0 : i32
    %c0_i32_0 = arith.constant 0 : i32
    return %1, %c0_i32 : i32, i32
  }
  func.func @transform_1(%arg0: i32, %arg1: i32) -> (i32, i32) {
    %c1_i32 = arith.constant 1 : i32
    %0 = arith.muli %arg0, %c1_i32 : i32
    %1 = arith.addi %0, %arg1 : i32
    %c0_i32 = arith.constant 0 : i32
    %c0_i32_0 = arith.constant 0 : i32
    return %1, %c0_i32 : i32, i32
  }
  func.func @transform_2(%arg0: i32, %arg1: i32) -> (i32, i32) {
    %c0_i32 = arith.constant 0 : i32
    %c0_i32_0 = arith.constant 0 : i32
    return %arg0, %c0_i32 : i32, i32
  }
}

</mosaic_0001>

<bundles_post_ra>
// kernel: tpu_custom_call.1
= control target key start
LH: loop header
LB: loop body
LE: loop exit
PB: predicated region body
PF: predicated region fallthrough
CT: control target
= control target key end

     0   :  { %7 = vsyncpa [#allocation4], 0  ;;  %s242_s0 = inlined_call_operand.hbm [shape: f32[16,128], index: 0, kind: input, shape index: {}]   ;;  %s243_s1 = inlined_call_operand.hbm [shape: f32[16,128], index: 1, kind: input, shape index: {}]   ;;  %s244_s2 = inlined_call_operand.hbm [shape: f32[1,1], index: 2, kind: output, shape index: {}]  }
   0x1   :  { %8 = vsyncpa [#allocation7], 0 }
   0x2   :  { %9 = vsyncpa [#allocation5], 0  ;;  %s186_s9 = smov [#allocation3]   ;;  %s126_s13 = scalar_lea.hbm %s242_s0, 256 }
   0x3   :  { %s19_s10 = sshll.u32 %s186_s9, 4  ;;  %p127_p0 = scmp.ne.s32.totalorder %s242_s0, %s126_s13  ;;  %s20_s10 = int_to_ptr.vmem [resolvable:$true] %s19_s10 }
   0x4   :  { %p130_p1 = scmp.lt.u32.totalorder %s126_s13, %s242_s0 }
   0x6   :  { %p132_p2 = pnand %p130_p1, %p127_p0 }
   0x8   :  { %135 = shalt.err (!%p132_p2)
}
   0x9   :  { %s136_s18 = scalar_lea.vmem %s20_s10, 256  ;;  %p141_p4 = scmp.lt.s32.totalorder %s20_s10, %s20_s10 }
   0xa   :  { %p137_p3 = scmp.ne.s32.totalorder %s20_s10, %s136_s18  ;;  %p142_p5 = scmp.lt.s32.totalorder %s136_s18, %s136_s18 }
   0xc   :  { %p143_p6 = por %p142_p5, %p141_p4 }
   0xe   :  { %p144_p7 = pnand %p143_p6, %p137_p3 }
  0x10   :  { %147 = shalt.err (!%p144_p7)
}
  0x11   :  { %s187_s19 = smov 128   ;;  %s188_s20 = smov 8  }
  0x12   :  { %25 = dma.hbm_to_vmem [thread:$0]  %s242_s0, 256, %s20_s10, [#allocation4], %s187_s19, %s187_s19, %s188_s20  }
  0x13   :  { %s189_s23 = smov [#allocation6]   ;;  %s148_s27 = scalar_lea.hbm %s243_s1, 256 }
  0x14   :  { %s35_s24 = sshll.u32 %s189_s23, 4  ;;  %p149_p8 = scmp.ne.s32.totalorder %s243_s1, %s148_s27  ;;  %s36_s24 = int_to_ptr.vmem [resolvable:$true] %s35_s24 }
  0x15   :  { %p152_p9 = scmp.lt.u32.totalorder %s148_s27, %s243_s1 }
  0x17   :  { %p154_p10 = pnand %p152_p9, %p149_p8 }
  0x19   :  { %157 = shalt.err (!%p154_p10)
}
  0x1a   :  { %s158_s4 = scalar_lea.vmem %s36_s24, 256  ;;  %p163_p12 = scmp.lt.s32.totalorder %s36_s24, %s36_s24 }
  0x1b   :  { %p159_p11 = scmp.ne.s32.totalorder %s36_s24, %s158_s4  ;;  %p164_p13 = scmp.lt.s32.totalorder %s158_s4, %s158_s4 }
  0x1d   :  { %p165_p0 = por %p164_p13, %p163_p12 }
  0x1f   :  { %p166_p1 = pnand %p165_p0, %p159_p11 }
  0x21   :  { %169 = shalt.err (!%p166_p1)
}
  0x22   :  { %41 = dma.hbm_to_vmem [thread:$0]  %s243_s1, 256, %s36_s24, [#allocation7], %s187_s19, %s187_s19, %s188_s20  }
  0x23   :  { %180 = dma.done.wait [#allocation4], 256  }
  0x24   :  { %181 = vsyncadd [#allocation4], 4294967040 }
  0x25   :  { %182 = dma.done.wait [#allocation7], 256  }
  0x26   :  { %183 = vsyncadd [#allocation7], 4294967040  ;;  %v59_v0 = vld [vmem:[#allocation6] sm:$0xff]  ;;  %v60_v1 = vld [vmem:[#allocation6 + $0x8] sm:$0xff]  ;;  %s170_s8 = scalar_lea.hbm %s244_s2, 16 }
  0x27   :  { %v65_v2 = vand.u32 2147483647, %v59_v0  ;;  %v66_v3 = vand.u32 2147483647, %v60_v1  ;;  %v57_v8 = vld [vmem:[#allocation3] sm:$0xff]  ;;  %v58_v9 = vld [vmem:[#allocation3 + $0x8] sm:$0xff]  ;;  %p171_p2 = scmp.ne.s32.totalorder %s244_s2, %s170_s8  ;;  %p174_p3 = scmp.lt.u32.totalorder %s170_s8, %s244_s2 }
  0x28   :  { %v61_v10 = vsub.f32 %v57_v8, %v59_v0  ;;  %v62_v11 = vsub.f32 %v58_v9, %v60_v1 }
  0x29   :  { %v67_v4 = vadd.f32 1e-06, %v65_v2  ;;  %v68_v5 = vadd.f32 1e-06, %v66_v3  ;;  %p176_p4 = pnand %p174_p3, %p171_p2 }
  0x2a   :  { %v63_v12 = vmul.f32 %v61_v10, %v61_v10  ;;  %v64_v13 = vmul.f32 %v62_v11, %v62_v11 }
  0x2b   :  { %118 = vtanh.f32 %v67_v4 }
  0x2c   :  { %120 = vtanh.f32 %v68_v5 }
  0x35   :  { %v119_v6 = vpop.eup %118 }
  0x36   :  { %v121_v7 = vpop.eup %120  ;;  %122 = vrcp.f32 %v119_v6 }
  0x37   :  { %124 = vrcp.f32 %v121_v7 }
  0x40   :  { %v123_v14 = vpop.eup %122 }
  0x41   :  { %v125_v15 = vpop.eup %124  ;;  %v75_v16 = vmul.f32 %v123_v14, %v63_v12 }
  0x42   :  { %v76_v17 = vmul.f32 %v125_v15, %v64_v13 }
  0x44   :  { %v78_v18 = vadd.f32 %v76_v17, %v75_v16 }
  0x46   :  { %85 = vadd.xlane.f32.xlu0 %v78_v18 }
  0xd3   :  { %v86_v19 = vpop.xlane.xlu0 %85 }
  0xd4   :  { %v87_v20 = vrot.slane %v86_v19, 4 }
  0xd6   :  { %v88_v21 = vadd.f32 %v87_v20, %v86_v19 }
  0xd8   :  { %v89_v22 = vrot.slane %v88_v21, 2 }
  0xda   :  { %v90_v23 = vadd.f32 %v89_v22, %v88_v21 }
  0xdc   :  { %v91_v24 = vrot.slane %v90_v23, 1 }
  0xde   :  { %v92_v25 = vadd.f32 %v91_v24, %v90_v23 }
  0xe0   :  { %111 = vpush %v92_v25 }
 0x111   :  { %s112_s1 = spop %111 }
 0x112   :  { %95 = sst [smem:[#allocation8]] %s112_s1 }
 0x113   :  { %179 = shalt.err (!%p176_p4)
}
 0x114   :  { %s190_s13 = smov [#allocation8]  }
 0x115   :  { %103 = dma.smem_to_hbm %s190_s13, 16, %s244_s2, [#allocation5]  }
 0x116   :  { %184 = dma.done.wait [#allocation5], 16  }
 0x117   :  { %185 = vsyncadd [#allocation5], 4294967280 }
 0x118   :  { %107 = sfence }
 0x119   :  { %108 = vsyncpa [#allocation4], 1 }
 0x11a   :  { %109 = vsyncpa [#allocation7], 1 }
 0x11b   :  { %110 = vsyncpa [#allocation5], 1 }

</bundles_post_ra>
